<compile_context>
chip_gen: v7x
topology: tpu7x:2x2x1
jax: 0.10.0
libtpu: 0.0.40
codegen_flags: <defaults>
</compile_context>

<pallas_src>
import functools

import jax
import jax.numpy as jnp
from jax.experimental import pallas as pl
from jax.experimental.pallas import tpu as pltpu

NEG_INF = -1e30          # safe "-inf" for masked softmax (avoids inf - inf NaNs)
NEG_SLOPE = 0.2          # PyG GATConv default LeakyReLU slope
LANE = 128               # TPU lane width
_FUSED_MAX_NODES = 1024  # all-resident fused kernel up to here; row-tiled above
_VMEM_CAP = 64 * 1024 * 1024  # conservative scoped-VMEM cap (v7x physical = 64 MiB)


# -----------------------------------------------------------------------------
# Shared per-tile GAT layer math (attention over ALL source nodes + aggregation)
# -----------------------------------------------------------------------------
def _gat_attention_aggregate(h_dst, h_src, adj, b, feat):
    """h_dst: [M, feat+2] dst-node features, h_src: [N, feat+2] all src features,
    adj: [M, N] int8 0/1 (dst rows x src cols), b: [1, feat+2].
    Columns feat / feat+1 of h hold alpha_src / alpha_dst (host-folded into W)."""
    alpha_dst = h_dst[:, feat + 1:feat + 2]                     # [M, 1]
    alpha_src_row = h_src[:, feat:feat + 1].T                   # [1, N] (XLU transpose)
    e = alpha_dst + alpha_src_row                               # logit for edge (j -> i)
    e = jnp.where(e > 0, e, NEG_SLOPE * e)                      # LeakyReLU(0.2)
    e = jnp.where(adj != 0, e, NEG_INF)                         # mask non-edges
    m = jnp.max(e, axis=1, keepdims=True)
    p = jnp.exp(e - m)                                          # masked entries -> exactly 0
    denom = jnp.sum(p, axis=1, keepdims=True)                   # >= 1 (self-loops guaranteed)
    # Deferred softmax normalization: aggregate raw bf16 weights on the MXU, then
    # scale only the [M, feat+2] result (EUP reciprocal) instead of the [M, N] map.
    agg = jnp.dot(p.astype(jnp.bfloat16), h_src.astype(jnp.bfloat16),
                  preferred_element_type=jnp.float32)
    return agg * pl.reciprocal(denom, approx=True) + b


# -----------------------------------------------------------------------------
# Fused two-layer kernel (small graphs: everything VMEM-resident, no grid)
# -----------------------------------------------------------------------------
def _gatnet_fused_kernel(x_ref, adj_ref, w1_ref, b1_ref, w2_ref, b2_ref, out_ref,
                         *, f1, f2):
    # h1 carries [x@W1 | alpha_src | alpha_dst] thanks to the host-side W augmentation.
    h1 = jnp.dot(x_ref[...], w1_ref[...], preferred_element_type=jnp.float32)
    # int8 adjacency is re-read per layer (cheap VMEM read) instead of holding an
    # f32 copy live across both layers.
    y1 = _gat_attention_aggregate(h1, h1, adj_ref[...], b1_ref[...], f1)
    x2 = jnp.maximum(y1, 0.0)                                   # F.relu; junk alpha cols are
                                                                # killed by W2_aug's zero rows
    h2 = jnp.dot(x2, w2_ref[...], preferred_element_type=jnp.float32)
    out = _gat_attention_aggregate(h2, h2, adj_ref[...], b2_ref[...], f2)
    out_ref[...] = out.astype(out_ref.dtype)                    # [N, 128] lane-dense store


# -----------------------------------------------------------------------------
# Row-tiled single-layer kernel (large graphs: grid over dst-row tiles)
# -----------------------------------------------------------------------------
def _gat_layer_row_kernel(x_tile_ref, x_full_ref, adj_ref, w_ref, b_ref, out_ref,
                          *, feat, apply_relu):
    w = w_ref[...]
    # TODO(synk): h_full and the [N,1]->[1,N] alpha_src transpose are recomputed per
    # row tile; hoisting them into persistent VMEM scratch (review item) conflicts with
    # "parallel" megacore semantics (only the core owning tile 0 would initialize it),
    # so we keep the cheap MXU recompute. x_full/W/b blocks are fetched only once
    # (their block index never changes across the grid).
    h_full = jnp.dot(x_full_ref[...], w, preferred_element_type=jnp.float32)  # [N, feat+2]
    h_dst = jnp.dot(x_tile_ref[...], w, preferred_element_type=jnp.float32)   # [TM, feat+2]
    out = _gat_attention_aggregate(h_dst, h_full, adj_ref[...], b_ref[...], feat)
    if apply_relu:
        out = jnp.maximum(out, 0.0)
    out_ref[...] = out.astype(out_ref.dtype)


# -----------------------------------------------------------------------------
# Host-side helpers
# -----------------------------------------------------------------------------
def build_adjacency(edge_index, num_nodes):
    """Dense int8 adjacency (row i = dst, col j = src), with self-loops.
    Set semantics: duplicate edges collapse (matches the in-file reference)."""
    src, dst = edge_index[0], edge_index[1]
    adj = jnp.zeros((num_nodes, num_nodes), jnp.int8).at[dst, src].set(1)
    return jnp.maximum(adj, jnp.eye(num_nodes, dtype=jnp.int8))


def augment_gat_params(w, a_src, a_dst, bias, *, col_pad_to=None, extra_in_rows=0):
    """W_aug = [W (col-padded) | W a_src^T | W a_dst^T]; bias padded to match.

    The two extra columns make alpha_src / alpha_dst fall out of the x @ W MXU pass
    (output width stays <= 128, so they're free); `extra_in_rows` zero rows absorb the
    junk alpha columns carried by the previous layer's output.
    Returns (w_aug, b_aug, feat) with `feat` the column index of alpha_src."""
    out_dim = w.shape[1]
    feat = out_dim if col_pad_to is None else col_pad_to
    w_feat = w if feat == out_dim else jnp.pad(w, ((0, 0), (0, feat - out_dim)))
    w_aug = jnp.concatenate([w_feat, w @ a_src.T, w @ a_dst.T], axis=1)
    if extra_in_rows:
        w_aug = jnp.pad(w_aug, ((0, extra_in_rows), (0, 0)))
    b_aug = jnp.pad(bias, ((0, 0), (0, feat + 2 - out_dim)))
    return w_aug, b_aug, feat


def _vmem_limit(n_bytes):
    return int(min(_VMEM_CAP, max(32 * 1024 * 1024, n_bytes)))


def _pick_row_tile():
    """Per-generation dst-row tile: v7x (64 MiB VMEM) -> 256, v5e/v6e (128 MiB) -> 1024."""
    try:
        kind = jax.devices()[0].device_kind.lower()
    except Exception:
        return 512
    if "v7" in kind:
        return 256
    if "v5" in kind or "v6" in kind:
        return 1024
    return 512


def _gatnet_fused(x, adj, w1a, b1a, w2a, b2a, f1, f2):
    n, din = x.shape
    out_w = f2 + 2                                              # = 128 (lane-dense store)
    vmem = pl.BlockSpec(memory_space=pltpu.MemorySpace.VMEM)
    # int8 adjacency + ~4 live [N, N] f32 temporaries dominate the footprint.
    need = n * n * (1 + 16) + 8 * n * (din + (f1 + 2) + out_w) + (1 << 20)
    return pl.pallas_call(
        functools.partial(_gatnet_fused_kernel, f1=f1, f2=f2),
        out_shape=jax.ShapeDtypeStruct((n, out_w), jnp.float32),
        in_specs=[vmem] * 6,
        out_specs=vmem,
        compiler_params=pltpu.CompilerParams(vmem_limit_bytes=_vmem_limit(need)),
    )(x, adj, w1a, b1a, w2a, b2a)


def _gat_layer_row_tiled(x, adj, w_aug, b_aug, feat, apply_relu, row_tile):
    n, din = x.shape
    faug = w_aug.shape[1]
    assert n % row_tile == 0, "node count must be padded to the row tile"
    # double-buffered (TM, N) int8 adjacency + ~4 live [TM, N] f32 temporaries.
    need = 2 * row_tile * n * (1 + 8) + 8 * n * (din + faug) + (1 << 20)
    return pl.pallas_call(
        functools.partial(_gat_layer_row_kernel, feat=feat, apply_relu=apply_relu),
        out_shape=jax.ShapeDtypeStruct((n, faug), jnp.float32),
        grid=(n // row_tile,),
        in_specs=[
            pl.BlockSpec((row_tile, din), lambda i: (i, 0)),    # dst-row tile of features
            pl.BlockSpec((n, din), lambda i: (0, 0)),           # all src features (fetched once)
            pl.BlockSpec((row_tile, n), lambda i: (i, 0)),      # dst rows of int8 adjacency
            pl.BlockSpec((din, faug), lambda i: (0, 0)),        # W_aug (resident)
            pl.BlockSpec((1, faug), lambda i: (0, 0)),          # bias (resident)
        ],
        out_specs=pl.BlockSpec((row_tile, faug), lambda i: (i, 0)),
        compiler_params=pltpu.CompilerParams(
            dimension_semantics=("parallel",),                  # shard row tiles over v7x's 2 TCs
            vmem_limit_bytes=_vmem_limit(need)),
    )(x, x, adj, w_aug, b_aug)


def gatnet_forward(x, edge_index, params, *, force_tiled=False, row_tile=None):
    """GATNet forward: GATConv(in, H) -> ReLU -> GATConv(H, 1)."""
    (w1, a1s, a1d, b1), (w2, a2s, a2d, b2) = params
    n = x.shape[0]
    out_dim = w2.shape[1]

    w1a, b1a, f1 = augment_gat_params(w1, a1s, a1d, b1)
    # Layer 2: pad the tiny output width so the final store is a lane-dense 128-wide slab.
    w2a, b2a, f2 = augment_gat_params(w2, a2s, a2d, b2,
                                      col_pad_to=LANE - 2, extra_in_rows=2)

    if not force_tiled and n <= _FUSED_MAX_NODES:
        adj = build_adjacency(edge_index, n)                    # int8: the only O(N^2) HBM read
        out = _gatnet_fused(x, adj, w1a, b1a, w2a, b2a, f1, f2)
        return out[:, :out_dim]

    # Large graphs: per-layer dst-row-tiled grid (adjacency streamed in (TM, N) blocks).
    tm = row_tile if row_tile is not None else _pick_row_tile()
    n_pad = ((n + tm - 1) // tm) * tm
    x_p = jnp.pad(x, ((0, n_pad - n), (0, 0)))
    adj = build_adjacency(edge_index, n_pad)                    # padded rows: self-loops only
    h1 = _gat_layer_row_tiled(x_p, adj, w1a, b1a, f1, True, tm)
    out = _gat_layer_row_tiled(h1, adj, w2a, b2a, f2, False, tm)
    return out[:n, :out_dim]


# -----------------------------------------------------------------------------
# Parameter init (shapes match PyG GATConv with heads=1, concat=True)
# -----------------------------------------------------------------------------
def init_gatconv_params(key, in_dim, out_dim):
    k1, k2, k3 = jax.random.split(key, 3)
    lim_w = (6.0 / (in_dim + out_dim)) ** 0.5
    w = jax.random.uniform(k1, (in_dim, out_dim), jnp.float32, -lim_w, lim_w)
    lim_a = (6.0 / (out_dim + 1)) ** 0.5
    a_src = jax.random.uniform(k2, (1, out_dim), jnp.float32, -lim_a, lim_a)
    a_dst = jax.random.uniform(k3, (1, out_dim), jnp.float32, -lim_a, lim_a)
    bias = jnp.zeros((1, out_dim), jnp.float32)
    return w, a_src, a_dst, bias


# -----------------------------------------------------------------------------
# Pure-JAX reference (exact f32 math) for the sanity check
# -----------------------------------------------------------------------------
def _gat_layer_ref(x, adj, w, a_src, a_dst, bias, apply_relu):
    h = x @ w
    e = (h * a_dst).sum(-1, keepdims=True) + (h * a_src).sum(-1, keepdims=True).T
    e = jnp.where(e > 0, e, NEG_SLOPE * e)
    e = jnp.where(adj > 0, e, NEG_INF)
    p = jnp.exp(e - e.max(axis=1, keepdims=True))
    p = jnp.where(adj > 0, p, 0.0)
    att = p / p.sum(axis=1, keepdims=True)
    out = att @ h + bias
    return jnp.maximum(out, 0.0) if apply_relu else out


def gatnet_ref(x, edge_index, params):
    n = x.shape[0]
    adj = build_adjacency(edge_index, n).astype(jnp.float32)
    p1, p2 = params
    h = _gat_layer_ref(x, adj, *p1, True)
    return _gat_layer_ref(h, adj, *p2, False)


def _check(name, out, ref, atol=5e-2, rtol=5e-2):
    # bf16 MXU aggregation + approx reciprocal give ~1e-2-level relative error (per the
    # perf review); the math is otherwise identical to the exact-f32 reference.
    if not jnp.allclose(out, ref, atol=atol, rtol=rtol):
        err = float(jnp.max(jnp.abs(out - ref)))
        raise AssertionError(f"Pallas GATNet mismatch ({name}): max |diff| = {err:.4g}")


if __name__ == "__main__":
    key = jax.random.PRNGKey(0)
    k_x, k_e, k_p1, k_p2, k_x2, k_e2 = jax.random.split(key, 6)

    in_dim, hidden_dim = 5, 32           # GATConv(5, 32) -> ReLU -> GATConv(32, 1)
    params = (init_gatconv_params(k_p1, in_dim, hidden_dim),
              init_gatconv_params(k_p2, hidden_dim, 1))

    # Small graph -> fused all-resident kernel.
    n_small, m_small = 16, 40
    x_s = jax.random.normal(k_x, (n_small, in_dim), jnp.float32)
    e_s = jax.random.randint(k_e, (2, m_small), 0, n_small, dtype=jnp.int32)
    out_s = jax.block_until_ready(gatnet_forward(x_s, e_s, params))
    _check("fused", out_s, gatnet_ref(x_s, e_s, params))

    # Larger graph -> exercises the dst-row-tiled grid path (incl. row padding 250 -> 256).
    n_big, m_big = 250, 1024
    x_b = jax.random.normal(k_x2, (n_big, in_dim), jnp.float32)
    e_b = jax.random.randint(k_e2, (2, m_big), 0, n_big, dtype=jnp.int32)
    out_b = jax.block_until_ready(
        gatnet_forward(x_b, e_b, params, force_tiled=True, row_tile=128))
    _check("row-tiled", out_b, gatnet_ref(x_b, e_b, params))

    print("KERNEL_OK")
</pallas_src>

<mosaic_0001>
module attributes {stable_mosaic.version = 11 : i64} {
  func.func @_gatnet_fused_kernel(%arg0: memref<16x5xf32, #tpu.memory_space<vmem>>, %arg1: memref<16x16xi8, #tpu.memory_space<vmem>>, %arg2: memref<5x34xf32, #tpu.memory_space<vmem>>, %arg3: memref<1x34xf32, #tpu.memory_space<vmem>>, %arg4: memref<34x128xf32, #tpu.memory_space<vmem>>, %arg5: memref<1x128xf32, #tpu.memory_space<vmem>>, %arg6: memref<16x128xf32, #tpu.memory_space<vmem>>) attributes {dimension_semantics = [], scalar_prefetch = 0 : i64, scratch_operands = 0 : i64, tpu.core_type = #tpu.core_type<tc>} {
    %c0 = arith.constant 0 : index
    %c0_0 = arith.constant 0 : index
    %0 = vector.load %arg0[%c0, %c0_0] : memref<16x5xf32, #tpu.memory_space<vmem>>, vector<16x5xf32>
    %c0_1 = arith.constant 0 : index
    %c0_2 = arith.constant 0 : index
    %1 = vector.load %arg2[%c0_1, %c0_2] : memref<5x34xf32, #tpu.memory_space<vmem>>, vector<5x34xf32>
    %cst = arith.constant dense<0.000000e+00> : vector<16x34xf32>
    %2 = tpu.matmul %0, %1, %cst {dimension_numbers = #tpu.dot_dimension_numbers<[1], [0], [0], [1], [0, 0, 1, 1], [], []>} : vector<16x5xf32>, vector<5x34xf32>, vector<16x34xf32> -> vector<16x34xf32>
    %c0_3 = arith.constant 0 : index
    %c0_4 = arith.constant 0 : index
    %3 = vector.load %arg1[%c0_3, %c0_4] : memref<16x16xi8, #tpu.memory_space<vmem>>, vector<16x16xi8>
    %c0_5 = arith.constant 0 : index
    %c0_6 = arith.constant 0 : index
    %4 = vector.load %arg3[%c0_5, %c0_6] : memref<1x34xf32, #tpu.memory_space<vmem>>, vector<1x34xf32>
    %5 = vector.extract_strided_slice %2 {offsets = [0, 33], sizes = [16, 1], strides = [1, 1]} : vector<16x34xf32> to vector<16x1xf32>
    %6 = vector.extract_strided_slice %2 {offsets = [0, 32], sizes = [16, 1], strides = [1, 1]} : vector<16x34xf32> to vector<16x1xf32>
    %7 = tpu.transpose %6, [1, 0] : vector<16x1xf32> -> vector<1x16xf32>
    %8 = vector.broadcast %5 : vector<16x1xf32> to vector<16x16xf32>
    %9 = vector.broadcast %7 : vector<1x16xf32> to vector<16x16xf32>
    %10 = arith.addf %8, %9 : vector<16x16xf32>
    %cst_7 = arith.constant 0.000000e+00 : f32
    %11 = vector.broadcast %cst_7 : f32 to vector<16x16xf32>
    %12 = arith.cmpf ogt, %10, %11 : vector<16x16xf32>
    %cst_8 = arith.constant 2.000000e-01 : f32
    %13 = vector.broadcast %cst_8 : f32 to vector<16x16xf32>
    %14 = arith.mulf %13, %10 : vector<16x16xf32>
    %15 = arith.select %12, %10, %14 : vector<16x16xi1>, vector<16x16xf32>
    %c0_i8 = arith.constant 0 : i8
    %16 = vector.broadcast %c0_i8 : i8 to vector<16x16xi8>
    %17 = arith.cmpi ne, %3, %16 : vector<16x16xi8>
    %cst_9 = arith.constant -1.000000e+30 : f32
    %18 = vector.broadcast %cst_9 : f32 to vector<16x16xf32>
    %19 = arith.select %17, %15, %18 : vector<16x16xi1>, vector<16x16xf32>
    %cst_10 = arith.constant dense<0xFF800000> : vector<16xf32>
    %20 = vector.multi_reduction <maximumf>, %19, %cst_10 [1] : vector<16x16xf32> to vector<16xf32>
    %21 = vector.shape_cast %20 : vector<16xf32> to vector<16x1xf32>
    %22 = vector.broadcast %21 : vector<16x1xf32> to vector<16x16xf32>
    %23 = arith.subf %19, %22 : vector<16x16xf32>
    %24 = math.exp %23 : vector<16x16xf32>
    %cst_11 = arith.constant dense<0.000000e+00> : vector<16xf32>
    %25 = vector.multi_reduction <add>, %24, %cst_11 [1] : vector<16x16xf32> to vector<16xf32>
    %26 = vector.shape_cast %25 : vector<16xf32> to vector<16x1xf32>
    %27 = arith.truncf %24 : vector<16x16xf32> to vector<16x16xbf16>
    %28 = arith.truncf %2 : vector<16x34xf32> to vector<16x34xbf16>
    %cst_12 = arith.constant dense<0.000000e+00> : vector<16x34xf32>
    %29 = tpu.matmul %27, %28, %cst_12 {dimension_numbers = #tpu.dot_dimension_numbers<[1], [0], [0], [1], [0, 0, 1, 1], [], []>} : vector<16x16xbf16>, vector<16x34xbf16>, vector<16x34xf32> -> vector<16x34xf32>
    %30 = tpu.reciprocal %26 {approx = true} : vector<16x1xf32> -> vector<16x1xf32>
    %31 = vector.broadcast %30 : vector<16x1xf32> to vector<16x34xf32>
    %32 = arith.mulf %29, %31 : vector<16x34xf32>
    %33 = vector.broadcast %4 : vector<1x34xf32> to vector<16x34xf32>
    %34 = arith.addf %32, %33 : vector<16x34xf32>
    %cst_13 = arith.constant 0.000000e+00 : f32
    %35 = vector.broadcast %cst_13 : f32 to vector<16x34xf32>
    %36 = arith.maximumf %34, %35 : vector<16x34xf32>
    %c0_14 = arith.constant 0 : index
    %c0_15 = arith.constant 0 : index
    %37 = vector.load %arg4[%c0_14, %c0_15] : memref<34x128xf32, #tpu.memory_space<vmem>>, vector<34x128xf32>
    %cst_16 = arith.constant dense<0.000000e+00> : vector<16x128xf32>
    %38 = tpu.matmul %36, %37, %cst_16 {dimension_numbers = #tpu.dot_dimension_numbers<[1], [0], [0], [1], [0, 0, 1, 1], [], []>} : vector<16x34xf32>, vector<34x128xf32>, vector<16x128xf32> -> vector<16x128xf32>
    %c0_17 = arith.constant 0 : index
    %c0_18 = arith.constant 0 : index
    %39 = vector.load %arg1[%c0_17, %c0_18] : memref<16x16xi8, #tpu.memory_space<vmem>>, vector<16x16xi8>
    %c0_19 = arith.constant 0 : index
    %c0_20 = arith.constant 0 : index
    %40 = vector.load %arg5[%c0_19, %c0_20] : memref<1x128xf32, #tpu.memory_space<vmem>>, vector<1x128xf32>
    %41 = vector.extract_strided_slice %38 {offsets = [0, 127], sizes = [16, 1], strides = [1, 1]} : vector<16x128xf32> to vector<16x1xf32>
    %42 = vector.extract_strided_slice %38 {offsets = [0, 126], sizes = [16, 1], strides = [1, 1]} : vector<16x128xf32> to vector<16x1xf32>
    %43 = tpu.transpose %42, [1, 0] : vector<16x1xf32> -> vector<1x16xf32>
    %44 = vector.broadcast %41 : vector<16x1xf32> to vector<16x16xf32>
    %45 = vector.broadcast %43 : vector<1x16xf32> to vector<16x16xf32>
    %46 = arith.addf %44, %45 : vector<16x16xf32>
    %cst_21 = arith.constant 0.000000e+00 : f32
    %47 = vector.broadcast %cst_21 : f32 to vector<16x16xf32>
    %48 = arith.cmpf ogt, %46, %47 : vector<16x16xf32>
    %cst_22 = arith.constant 2.000000e-01 : f32
    %49 = vector.broadcast %cst_22 : f32 to vector<16x16xf32>
    %50 = arith.mulf %49, %46 : vector<16x16xf32>
    %51 = arith.select %48, %46, %50 : vector<16x16xi1>, vector<16x16xf32>
    %c0_i8_23 = arith.constant 0 : i8
    %52 = vector.broadcast %c0_i8_23 : i8 to vector<16x16xi8>
    %53 = arith.cmpi ne, %39, %52 : vector<16x16xi8>
    %cst_24 = arith.constant -1.000000e+30 : f32
    %54 = vector.broadcast %cst_24 : f32 to vector<16x16xf32>
    %55 = arith.select %53, %51, %54 : vector<16x16xi1>, vector<16x16xf32>
    %cst_25 = arith.constant dense<0xFF800000> : vector<16xf32>
    %56 = vector.multi_reduction <maximumf>, %55, %cst_25 [1] : vector<16x16xf32> to vector<16xf32>
    %57 = vector.shape_cast %56 : vector<16xf32> to vector<16x1xf32>
    %58 = vector.broadcast %57 : vector<16x1xf32> to vector<16x16xf32>
    %59 = arith.subf %55, %58 : vector<16x16xf32>
    %60 = math.exp %59 : vector<16x16xf32>
    %cst_26 = arith.constant dense<0.000000e+00> : vector<16xf32>
    %61 = vector.multi_reduction <add>, %60, %cst_26 [1] : vector<16x16xf32> to vector<16xf32>
    %62 = vector.shape_cast %61 : vector<16xf32> to vector<16x1xf32>
    %63 = arith.truncf %60 : vector<16x16xf32> to vector<16x16xbf16>
    %64 = arith.truncf %38 : vector<16x128xf32> to vector<16x128xbf16>
    %cst_27 = arith.constant dense<0.000000e+00> : vector<16x128xf32>
    %65 = tpu.matmul %63, %64, %cst_27 {dimension_numbers = #tpu.dot_dimension_numbers<[1], [0], [0], [1], [0, 0, 1, 1], [], []>} : vector<16x16xbf16>, vector<16x128xbf16>, vector<16x128xf32> -> vector<16x128xf32>
    %66 = tpu.reciprocal %62 {approx = true} : vector<16x1xf32> -> vector<16x1xf32>
    %67 = vector.broadcast %66 : vector<16x1xf32> to vector<16x128xf32>
    %68 = arith.mulf %65, %67 : vector<16x128xf32>
    %69 = vector.broadcast %40 : vector<1x128xf32> to vector<16x128xf32>
    %70 = arith.addf %68, %69 : vector<16x128xf32>
    %c0_28 = arith.constant 0 : index
    %c0_29 = arith.constant 0 : index
    %71 = vector.load %arg6[%c0_28, %c0_29] : memref<16x128xf32, #tpu.memory_space<vmem>>, vector<16x128xf32>
    tpu.vector_store %arg6[%c0_28, %c0_29], %70 {strides = array<i32>} : memref<16x128xf32, #tpu.memory_space<vmem>>, vector<16x128xf32>,
    return
  }
}

</mosaic_0001>

<bundles_post_ra>
// kernel: tpu_custom_call.1
= control target key start
LH: loop header
LB: loop body
LE: loop exit
PB: predicated region body
PF: predicated region fallthrough
CT: control target
= control target key end

     0   :  { %11 = vsyncpa [#allocation3], 0  ;;  %s807_s0 = inlined_call_operand.vmem [shape: f32[16,5], index: 0, kind: input, shape index: {}]   ;;  %s808_s1 = inlined_call_operand.vmem [shape: s8[16,16], index: 1, kind: input, shape index: {}]   ;;  %s809_s2 = inlined_call_operand.vmem [shape: f32[5,34], index: 2, kind: input, shape index: {}]   ;;  %s810_s3 = inlined_call_operand.vmem [shape: f32[1,34], index: 3, kind: input, shape index: {}]   ;;  %s811_s4 = inlined_call_operand.hbm [shape: f32[34,128], index: 4, kind: input, shape index: {}]   ;;  %s812_s5 = inlined_call_operand.vmem [shape: f32[1,128], index: 5, kind: input, shape index: {}]   ;;  %s813_s6 = inlined_call_operand.hbm [shape: f32[16,128], index: 6, kind: output, shape index: {}]  }
   0x1   :  { %12 = vsyncpa [#allocation4], 0  ;;  %s671_s21 = smov [#allocation2]   ;;  %s623_s25 = scalar_lea.hbm %s811_s4, 640 }
   0x2   :  { %s26_s22 = sshll.u32 %s671_s21, 4  ;;  %p624_p0 = scmp.ne.s32.totalorder %s811_s4, %s623_s25  ;;  %s27_s22 = int_to_ptr.vmem [resolvable:$true] %s26_s22 }
   0x3   :  { %p627_p1 = scmp.lt.u32.totalorder %s623_s25, %s811_s4 }
   0x5   :  { %p629_p2 = pnand %p627_p1, %p624_p0 }
   0x7   :  { %632 = shalt.err (!%p629_p2)
}
   0x8   :  { %s633_s30 = scalar_lea.vmem %s27_s22, 640  ;;  %p638_p4 = scmp.lt.s32.totalorder %s27_s22, %s27_s22 }
   0x9   :  { %p634_p3 = scmp.ne.s32.totalorder %s27_s22, %s633_s30  ;;  %p639_p5 = scmp.lt.s32.totalorder %s633_s30, %s633_s30 }
   0xb   :  { %p640_p6 = por %p639_p5, %p638_p4 }
   0xd   :  { %p641_p7 = pnand %p640_p6, %p634_p3 }
   0xf   :  { %644 = shalt.err (!%p641_p7)
}
  0x10   :  { %s672_s7 = smov 128   ;;  %s673_s8 = smov 8  }
  0x11   :  { %32 = dma.hbm_to_vmem [thread:$0]  %s811_s4, 640, %s27_s22, [#allocation3], %s672_s7, %s672_s7, %s673_s8  }
  0x12   :  { %667 = dma.done.wait [#allocation3], 640  }
  0x13   :  { %668 = vsyncadd [#allocation3], 4294966656  ;;  %vm51_vm0 = vcmask 1044480   ;;  %vm44_vm1 = vcmask 39936   ;;  %v43_v0 = vld [vmem:[%s809_s2] sm:$0x1f]  ;;  %v181_v10 = vlaneseq }
  0x14   :  { %v41_v1 = vld [vmem:[%s807_s0] sm:$0xff]  ;;  %v42_v2 = vld [vmem:[%s807_s0 + $0x8] sm:$0xff]  ;;  %555 = vmatprep.subr.msk.mxu0 %vm51_vm0, %v43_v0  ;;  %v674_v3 = vmov 33   ;;  %v675_v4 = vmov 0.0   ;;  %s676_s2 = smov 96   ;;  %v677_v16 = vmov 0  }
  0x15   :  { %557 = vmatprep.mubr.msk.f32.mxu0 %vm44_vm1, %v41_v1  ;;  %556 = vmatpush3.msk.msra.mxu0 %vm51_vm0, %v43_v0  ;;  %v131_v11 = vld [vmem:[%s808_s1 + $0x2] sm:$0x3]  ;;  %v130_v12 = vld [vmem:[%s808_s1] sm:$0x3]  ;;  %v749_v13 = vshrl.u32 %v181_v10, 7  ;;  %vm203_vm8 = vcmask 130048  }
  0x16   :  { %558 = vmatmul.mubr.msk.f32.vlgmr.msra.gmra.mrb[0].mxu0 %vm44_vm1, %v42_v2  ;;  %604 = vset.pattern.permute.xlu1 %v674_v3  ;;  %vm194_vm2 = vnez %v131_v11  ;;  %vm193_vm3 = vnez %v130_v12  ;;  %vm678_vm9 = vmmov 0   ;;  %v282_v47 = vld [vmem:[#allocation2] sm:$0xff]  ;;  %v283_v48 = vld [vmem:[#allocation2 + $0x8] sm:$0xff]  ;;  %v284_v50 = vld [vmem:[#allocation2 + $0x10] sm:$0xff]  ;;  %vm294_vm10 = vcmask 1041408   ;;  %s681_s22 = smov [#allocation5]  }
  0x17   :  { %560 = vmatprep.subr.bf16.mxu1 %v675_v4  ;;  %v183_v15 = vsub.s32 0, %v749_v13  ;;  %v196_v17 = vsel %vm194_vm2, 16843009, %v677_v16  ;;  %v195_v18 = vsel %vm193_vm3, 16843009, %v677_v16  ;;  %562 = vmatprep.mubr.msk.bf16.mxu1 %vm678_vm9, %v675_v4  ;;  %v585_v49 = vpack.c.bf16 %v283_v48, %v282_v47  ;;  %v285_v51 = vld [vmem:[#allocation2 + $0x18] sm:$0xff] }
  0x18   :  { %v198_v20 = vunpack.c.0.s8 %v196_v17  ;;  %v197_v21 = vunpack.c.0.s8 %v195_v18  ;;  %v589_v52 = vpack.c.bf16 %v285_v51, %v284_v50  ;;  %v286_v53 = vld [vmem:[#allocation2 + $0x20] sm:$0x3]  ;;  %vm287_vm11 = vcmask 277504   ;;  %s519_s23 = sshll.u32 %s681_s22, 4  ;;  %s520_s23 = int_to_ptr.vmem [resolvable:$true] %s519_s23 }
  0x19   :  { %586 = vmatprep.subr.bf16.mxu0 %v585_v49  ;;  %v535_v57 = vld [vmem:[%s810_s3] ss:$0 sm:$0xff]  ;;  %s680_s3 = smov 2   ;;  %s645_s24 = scalar_lea.vmem %s520_s23, 256 }
  0x1a   :  { %vm754_vm4 = vcmp.ne.s32.totalorder %v198_v20, 0  ;;  %vm758_vm5 = vcmp.ne.s32.totalorder %v197_v21, 0  ;;  %588 = vmatpush3.bf16.msra.mxu0 %v585_v49  ;;  %p646_p8 = scmp.ne.s32.totalorder %s520_s23, %s645_s24  ;;  %p650_p9 = scmp.lt.s32.totalorder %s520_s23, %s520_s23 }
  0x1b   :  { %590 = vmatprep.subr.bf16.mxu0 %v589_v52  ;;  %p651_p10 = scmp.lt.s32.totalorder %s645_s24, %s645_s24 }
  0x1d   :  { %p652_p11 = por %p651_p10, %p650_p9 }
  0x1e   :  { %592 = vmatpush3.bf16.msra.mxu0 %v589_v52 }
  0x1f   :  { %574 = vmatprep.subr.msk.mxu0 %vm294_vm10, %v286_v53  ;;  %p653_p12 = pnand %p652_p11, %p646_p8 }
  0x22   :  { %575 = vmatpush3.msk.msra.mxu0 %vm294_vm10, %v286_v53 }
  0xe9   :  { %v559_v5 = vpop.f32.mrb[0].mxu0 }
  0xea   :  { %v121_v6 = vpop.f32.mrb[1].mxu0 }
  0xeb   :  { %174 = vperm.xlu1 %604, %v121_v6   ;;  %135 = vrot.lane.b32.xlu0 %v121_v6, %s676_s2  ;;  %v223_v7 = vpack.c.bf16 %v559_v5, %v121_v6 }
  0xed   :  { %561 = vmatpush3.bf16.msra.mxu1 %v223_v7 }
  0xee   :  { %579 = vmatprep.subr.bf16.mxu1 %v675_v4 }
  0xef   :  { %178 = vperm.xlu1 %604, %v559_v5   ;;  %137 = vrot.lane.b32.xlu0 %v559_v5, %s676_s2  ;;  %v679_v5 = vmov 127  }
  0xf3   :  { %605 = vset.pattern.permute.xlu1 %v679_v5 }
 0x15d   :  { %v136_v8 = vpop.permute.xlu0 %135 }
 0x15e   :  { %141 = vxpose.xlu0.b32.start [1/2] (short) (narrow) %v136_v8, 8 }
 0x161   :  { %v138_v9 = vpop.permute.xlu0 %137 }
 0x162   :  { %142 = vxpose.xlu0.b32.end [2/2] (short) (narrow) %v138_v9, 8 }
 0x16a   :  { %v175_v14 = vpop.permute.xlu1 %174 }
 0x16e   :  { %v179_v23 = vpop.permute.xlu1 %178 }
 0x18b   :  { %606 = vset.pattern.permute.xlu0 %v679_v5 }
 0x1de   :  { %v157_v19 = vpop.trf.xlu0 }
 0x1df   :  { %v184_v22 = vrot.slane %v157_v19, %v183_v15 }
 0x1e1   :  { %v185_v24 = vadd.f32 %v184_v22, %v175_v14  ;;  %v186_v25 = vadd.f32 %v184_v22, %v179_v23 }
 0x1e3   :  { %vm188_vm6 = vcmp.gt.f32.partialorder %v186_v25, 0.0  ;;  %v190_v28 = vmul.f32 0.2, %v186_v25  ;;  %vm187_vm7 = vcmp.gt.f32.partialorder %v185_v24, 0.0  ;;  %v189_v29 = vmul.f32 0.2, %v185_v24 }
 0x1e5   :  { %v192_v30 = vsel %vm188_vm6, %v186_v25, %v190_v28  ;;  %v191_v31 = vsel %vm187_vm7, %v185_v24, %v189_v29 }
 0x1e6   :  { %v202_v32 = vsel %vm754_vm4, %v192_v30, -1e+30  ;;  %v201_v33 = vsel %vm758_vm5, %v191_v31, -1e+30 }
 0x1e7   :  { %v207_v34 = vsel %vm203_vm8, %v202_v32, -inf  ;;  %v204_v35 = vsel %vm203_vm8, %v201_v33, -inf }
 0x1e8   :  { %208 = vmax.xlane.f32.xlu0 %v207_v34  ;;  %205 = vmax.xlane.f32.xlu1 %v204_v35 }
 0x275   :  { %v209_v36 = vpop.xlane.xlu0 %208  ;;  %v206_v37 = vpop.xlane.xlu1 %205 }
 0x276   :  { %v211_v38 = vsub.f32 %v202_v32, %v209_v36  ;;  %v210_v39 = vsub.f32 %v201_v33, %v206_v37 }
 0x278   :  { %v214_v40 = vmul.f32 1.442695, %v211_v38  ;;  %v212_v41 = vmul.f32 1.442695, %v210_v39  ;;  %v540_v39 = vld [vmem:[%s812_s5] ss:$0 sm:$0xff] }
 0x27a   :  { %607 = vpow2.f32 %v214_v40 }
 0x27b   :  { %609 = vpow2.f32 %v212_v41 }
 0x284   :  { %v608_v42 = vpop.eup %607 }
 0x285   :  { %v610_v43 = vpop.eup %609  ;;  %v219_v46 = vsel %vm203_vm8, %v608_v42, 0.0 }
 0x286   :  { %v216_v44 = vsel %vm203_vm8, %v610_v43, 0.0  ;;  %v222_v45 = vpack.c.bf16 %v608_v42, %v610_v43 }
 0x287   :  { %217 = vadd.xlane.f32.xlu1 %v216_v44 }
 0x288   :  { %563 = vmatmul.mubr.msk.bf16.vlgmr.msra.gmra.mrb[0].mxu1 %vm203_vm8, %v222_v45 }
 0x289   :  { %581 = vmatprep.mubr.msk.bf16.mxu1 %vm678_vm9, %v675_v4 }
 0x28b   :  { %220 = vadd.xlane.f32.xlu1 %v219_v46 }
 0x314   :  { %v218_v54 = vpop.xlane.xlu1 %217 }
 0x315   :  { %611 = vrcp.f32 %v218_v54 }
 0x318   :  { %v221_v55 = vpop.xlane.xlu1 %220 }
 0x319   :  { %613 = vrcp.f32 %v221_v55 }
 0x31f   :  { %v612_v56 = vpop.eup %611 }
 0x323   :  { %v614_v61 = vpop.eup %613 }
 0x35b   :  { %v261_v58 = vpop.f32.mrb[0].mxu1 }
 0x35c   :  { %v270_v59 = vmul.f32 %v612_v56, %v261_v58  ;;  %v564_v60 = vpop.f32.mrb[1].mxu1 }
 0x35d   :  { %v264_v62 = vpop.f32.mrb[2].mxu1 }
 0x35e   :  { %v278_v63 = vadd.f32 %v535_v57, %v270_v59  ;;  %v271_v0 = vmul.f32 %v614_v61, %v264_v62  ;;  %v565_v1 = vpop.f32.mrb[3].mxu1 }
 0x360   :  { %v280_v2 = vmax.f32 %v278_v63, 0.0  ;;  %v279_v3 = vadd.f32 %v535_v57, %v271_v0 }
 0x362   :  { %v281_v4 = vmax.f32 %v279_v3, 0.0  ;;  %576 = vmatprep.mubr.msk.f32.mxu0 %vm287_vm11, %v280_v2 }
 0x364   :  { %577 = vmatmul.mubr.msk.f32.vlgmr.msra.gmra.mrb[2].mxu0 %vm287_vm11, %v281_v4 }
 0x437   :  { %v578_v6 = vpop.f32.mrb[2].mxu0 }
 0x438   :  { %v364_v7 = vpop.f32.mrb[3].mxu0 }
 0x439   :  { %v455_v8 = vpack.c.bf16 %v578_v6, %v364_v7  ;;  %376 = vrot.lane.b32.xlu1 %v364_v7, %s680_s3 }
 0x43b   :  { %580 = vmatpush3.bf16.msra.mxu1 %v455_v8 }
 0x43d   :  { %378 = vrot.lane.b32.xlu1 %v578_v6, %s680_s3 }
 0x441   :  { %419 = vperm.xlu1 %605, %v578_v6  }
 0x445   :  { %415 = vperm.xlu1 %605, %v364_v7  }
 0x4ab   :  { %v377_v9 = vpop.permute.xlu1 %376 }
 0x4ac   :  { %382 = vxpose.xlu1.b32.start [1/2] (short) (narrow) %v377_v9, 8 }
 0x4af   :  { %v379_v10 = vpop.permute.xlu1 %378 }
 0x4b0   :  { %383 = vxpose.xlu1.b32.end [2/2] (short) (narrow) %v379_v10, 8 }
 0x4c0   :  { %v420_v11 = vpop.permute.xlu1 %419 }
 0x4c4   :  { %v416_v12 = vpop.permute.xlu1 %415 }
 0x52c   :  { %v398_v14 = vpop.trf.xlu1 }
 0x52d   :  { %v425_v16 = vrot.slane %v398_v14, %v183_v15 }
 0x52f   :  { %v426_v17 = vadd.f32 %v425_v16, %v416_v12  ;;  %v427_v18 = vadd.f32 %v425_v16, %v420_v11 }
 0x531   :  { %vm428_vm12 = vcmp.gt.f32.partialorder %v426_v17, 0.0  ;;  %v430_v19 = vmul.f32 0.2, %v426_v17  ;;  %vm429_vm13 = vcmp.gt.f32.partialorder %v427_v18, 0.0  ;;  %v431_v20 = vmul.f32 0.2, %v427_v18 }
 0x533   :  { %v432_v21 = vsel %vm428_vm12, %v426_v17, %v430_v19  ;;  %v433_v22 = vsel %vm429_vm13, %v427_v18, %v431_v20 }
 0x534   :  { %v434_v23 = vsel %vm758_vm5, %v432_v21, -1e+30  ;;  %v435_v25 = vsel %vm754_vm4, %v433_v22, -1e+30 }
 0x535   :  { %v436_v24 = vsel %vm203_vm8, %v434_v23, -inf  ;;  %v439_v13 = vsel %vm203_vm8, %v435_v25, -inf }
 0x536   :  { %437 = vmax.xlane.f32.xlu0 %v436_v24 }
 0x53a   :  { %440 = vmax.xlane.f32.xlu0 %v439_v13 }
 0x5c3   :  { %v438_v15 = vpop.xlane.xlu0 %437 }
 0x5c4   :  { %v442_v28 = vsub.f32 %v434_v23, %v438_v15 }
 0x5c6   :  { %v444_v29 = vmul.f32 1.442695, %v442_v28 }
 0x5c7   :  { %v441_v30 = vpop.xlane.xlu0 %440 }
 0x5c8   :  { %615 = vpow2.f32 %v444_v29  ;;  %v443_v31 = vsub.f32 %v435_v25, %v441_v30 }
 0x5ca   :  { %v446_v32 = vmul.f32 1.442695, %v443_v31 }
 0x5cc   :  { %617 = vpow2.f32 %v446_v32 }
 0x5d2   :  { %v616_v33 = vpop.eup %615 }
 0x5d3   :  { %v448_v27 = vsel %vm203_vm8, %v616_v33, 0.0 }
 0x5d4   :  { %449 = vadd.xlane.f32.xlu0 %v448_v27 }
 0x5d6   :  { %v618_v34 = vpop.eup %617 }
 0x5d7   :  { %v451_v35 = vsel %vm203_vm8, %v618_v34, 0.0  ;;  %v454_v26 = vpack.c.bf16 %v618_v34, %v616_v33 }
 0x5d8   :  { %452 = vadd.xlane.f32.xlu0 %v451_v35 }
 0x5d9   :  { %582 = vmatmul.mubr.msk.bf16.vlgmr.msra.gmra.mrb[4].mxu1 %vm203_vm8, %v454_v26 }
 0x661   :  { %v450_v36 = vpop.xlane.xlu0 %449 }
 0x662   :  { %619 = vrcp.f32 %v450_v36 }
 0x665   :  { %v453_v37 = vpop.xlane.xlu0 %452 }
 0x666   :  { %621 = vrcp.f32 %v453_v37 }
 0x66c   :  { %v620_v38 = vpop.eup %619 }
 0x670   :  { %v622_v43 = vpop.eup %621 }
 0x6ac   :  { %v493_v40 = vpop.f32.mrb[4].mxu1 }
 0x6ad   :  { %v502_v41 = vmul.f32 %v620_v38, %v493_v40  ;;  %v583_v42 = vpop.f32.mrb[5].mxu1 }
 0x6ae   :  { %v496_v44 = vpop.f32.mrb[6].mxu1 }
 0x6af   :  { %v510_v45 = vadd.f32 %v540_v39, %v502_v41  ;;  %v503_v46 = vmul.f32 %v622_v43, %v496_v44  ;;  %v584_v47 = vpop.f32.mrb[7].mxu1 }
 0x6b1   :  { %512 = vst [vmem:[#allocation5] sm:$0xff] %v510_v45  ;;  %v511_v48 = vadd.f32 %v540_v39, %v503_v46 }
 0x6b3   :  { %513 = vst [vmem:[#allocation5 + $0x8] sm:$0xff] %v511_v48 }
 0x6b4   :  { %656 = shalt.err (!%p653_p12)
}
 0x6b5   :  { %s657_s26 = scalar_lea.hbm %s813_s6, 256 }
 0x6b6   :  { %p658_p13 = scmp.ne.s32.totalorder %s813_s6, %s657_s26  ;;  %p661_p0 = scmp.lt.u32.totalorder %s657_s26, %s813_s6 }
 0x6b8   :  { %p663_p1 = pnand %p661_p0, %p658_p13 }
 0x6ba   :  { %666 = shalt.err (!%p663_p1)
}
 0x6bb   :  { %525 = dma.vmem_to_hbm [thread:$0]  %s520_s23, 256, %s813_s6, [#allocation4], %s672_s7, %s672_s7, %s673_s8  }
 0x6bc   :  { %669 = dma.done.wait [#allocation4], 256  }
 0x6bd   :  { %670 = vsyncadd [#allocation4], 4294967040 }
 0x6be   :  { %529 = vsyncpa [#allocation3], 1 }
 0x6bf   :  { %530 = vsyncpa [#allocation4], 1 }

</bundles_post_ra>
